<compile_context>
chip_gen: v7x
topology: tpu7x:2x2x1
jax: 0.10.0
libtpu: 0.0.40
codegen_flags: <defaults>
</compile_context>

<pallas_src>
import numpy as np
import jax
import jax.numpy as jnp
from jax import lax
from jax.experimental import pallas as pl
from jax.experimental.pallas import tpu as pltpu


# ----------------------------- parameter setup -----------------------------

def hann_window(win_length):
    # torch.hann_window(periodic=True)
    n = np.arange(win_length, dtype=np.float64)
    return 0.5 - 0.5 * np.cos(2.0 * np.pi * n / win_length)


def dft_matrix_t_combined(n_fft, win_length, f_pad):
    """Combined [w*cos ; -w*sin] onesided-DFT matrix in (2*f_pad, n_fft) layout
    (frequency rows zero-padded per half to f_pad, a multiple of 128), so the
    windowed DFT is one plain (2*f_pad, n_fft) @ (n_fft, T) matmul with T in lanes."""
    n_freqs = n_fft // 2 + 1
    k = np.arange(n_freqs, dtype=np.float64)[:, None]    # (n_freqs, 1)
    n = np.arange(n_fft, dtype=np.float64)[None, :]      # (1, n_fft)
    ang = 2.0 * np.pi * k * n / n_fft
    w = hann_window(win_length)[None, :]                  # win_length == n_fft here
    comb = np.zeros((2 * f_pad, n_fft), dtype=np.float32)
    comb[:n_freqs, :] = (np.cos(ang) * w).astype(np.float32)
    comb[f_pad:f_pad + n_freqs, :] = (-np.sin(ang) * w).astype(np.float32)
    return comb


def melscale_fbanks_t_padded(n_freqs, f_pad, f_min, f_max, n_mels, sample_rate):
    """torchaudio.functional.melscale_fbanks (mel_scale='htk', norm=None), transposed
    to (n_mels, f_pad) with the frequency axis zero-padded to lane-dense width.
    Padded columns are zero so the padded matmul equals the unpadded one exactly."""
    # NOTE: torchaudio itself uses `sample_rate // 2` for the frequency grid.
    all_freqs = np.linspace(0.0, sample_rate // 2, n_freqs)
    m_min = 2595.0 * np.log10(1.0 + f_min / 700.0)
    m_max = 2595.0 * np.log10(1.0 + f_max / 700.0)
    m_pts = np.linspace(m_min, m_max, n_mels + 2)
    f_pts = 700.0 * (10.0 ** (m_pts / 2595.0) - 1.0)
    f_diff = f_pts[1:] - f_pts[:-1]                    # (n_mels + 1,)
    slopes = f_pts[None, :] - all_freqs[:, None]       # (n_freqs, n_mels + 2)
    down = -slopes[:, :-2] / f_diff[:-1]
    up = slopes[:, 2:] / f_diff[1:]
    fb = np.maximum(0.0, np.minimum(down, up))         # (n_freqs, n_mels)
    fb_t = np.zeros((n_mels, f_pad), dtype=np.float32)
    fb_t[:, :n_freqs] = fb.T.astype(np.float32)
    return fb_t


# ------------------------------- framing glue --------------------------------

def _frame_signal_t(x, n_fft, hop_length):
    """torch.stft(center=True, pad_mode='reflect') framing, emitted directly in
    (B, n_fft, T) layout (time axis last -> lane axis) and bf16.  Gather-free
    strided reshape + concat when hop_length divides n_fft (50%-overlap case)."""
    B, num_samples = x.shape
    pad = n_fft // 2
    assert num_samples > pad, "reflect padding requires num_samples > n_fft // 2"
    x_pad = jnp.pad(x.astype(jnp.float32), ((0, 0), (pad, pad)), mode="reflect")
    padded_len = num_samples + 2 * pad
    T = 1 + (padded_len - n_fft) // hop_length
    if n_fft % hop_length == 0:
        r = n_fft // hop_length
        q = padded_len // hop_length
        chunks = x_pad[:, : q * hop_length].reshape(B, q, hop_length)
        chunks_t = jnp.transpose(chunks, (0, 2, 1))          # (B, hop, q) -- 1x waveform
        frames = jnp.concatenate([chunks_t[:, :, j:j + T] for j in range(r)], axis=1)
    else:
        # fallback: XLA gather framing (slower, only for hop not dividing n_fft)
        idx = (np.arange(T)[None, :] * hop_length + np.arange(n_fft)[:, None])  # (n_fft, T)
        frames = x_pad[:, idx]
    # TODO(synk): framing in-kernel from x_pad would remove this ~2x-waveform HBM
    # materialization entirely; bf16 output halves it instead.
    return frames.astype(jnp.bfloat16), T


# --------------------------- generation-aware sizing ---------------------------

def _tpu_vmem_capacity_bytes():
    try:
        cap = int(pltpu.get_tpu_info().vmem_capacity_bytes)
        if cap > 0:
            return cap
    except Exception:
        pass
    return 64 * 1024 * 1024      # conservative fallback (v7x per-TensorCore)


def _num_tensorcores_per_device():
    """TensorCores a single Pallas device can shard a 'parallel' grid axis over."""
    try:
        kind = jax.devices()[0].device_kind.lower()
    except Exception:
        return 1
    if "lite" in kind or "v5e" in kind or "v6" in kind:
        return 1                 # v5e / v6e: single TensorCore
    if "v7" in kind or "v4" in kind or "v5p" in kind or "v5" in kind:
        return 2                 # v7x / megacore parts
    return 1


def _pick_batch_block(batch, t, n_fft, f_pad, n_mels, num_cores, vmem_limit_bytes,
                      max_block=16):
    """Largest batch block per grid step that fits the per-generation VMEM budget.
    Single-TC chips: just the biggest that fits (grid steps are pure serial overhead).
    Multi-TC chips: additionally keep >= num_cores grid steps for megacore sharding."""
    bf16, f32 = 2, 4
    # resident constants: dft (2*f_pad, n_fft) + mel (n_mels, f_pad); budget 3x
    # (double-buffered pipeline copies + one in-kernel value copy), conservative.
    const_bytes = (2 * f_pad * n_fft + n_mels * f_pad) * bf16 * 3
    # per-iteration intermediates (spec, power, power-bf16, mel/logmel) -- do NOT
    # scale with bb thanks to the fori_loop over the batch block.
    interm_bytes = (2 * f_pad * t + f_pad * t + 2 * n_mels * t) * f32 + f_pad * t * bf16
    # per-batch-element pipelined blocks: frames (bf16) + out (f32), double-buffered.
    per_elem = (n_fft * t * bf16 + n_mels * t * f32) * 2
    budget = int(vmem_limit_bytes * 0.8) - const_bytes - interm_bytes
    best = 1
    for bb in range(1, min(batch, max_block) + 1):
        if batch % bb:
            continue
        if bb * per_elem > budget:
            continue
        if num_cores > 1 and batch >= num_cores and (batch // bb) < num_cores:
            continue
        best = bb
    return best


# ------------------------------ Pallas kernel -------------------------------

def logfbank_kernel(frames_ref, dft_ref, mel_ref, out_ref):
    # frames_ref: (bb, n_fft, T) bf16
    # dft_ref:    (2*F_pad, n_fft) bf16   rows [0,F): w*cos, rows [F_pad,F_pad+F): -w*sin
    # mel_ref:    (n_mels, F_pad) bf16    mel filterbank (transposed, F zero-padded)
    # out_ref:    (bb, n_mels, T) f32
    f_pad = mel_ref.shape[1]
    dft_t = dft_ref[...]          # loop-invariant loads, hoisted out of the batch loop
    mel_t = mel_ref[...]
    inv_t = jnp.float32(1.0 / out_ref.shape[2])

    def per_batch(bi, carry):
        fr = frames_ref[bi]                                            # (n_fft, T) bf16
        # fused windowed one-sided DFT: plain (2*F_pad, n_fft) @ (n_fft, T), f32 acc
        spec = jnp.dot(dft_t, fr, preferred_element_type=jnp.float32)  # (2*F_pad, T)
        re = spec[:f_pad, :]
        im = spec[f_pad:, :]
        power = re * re + im * im                                      # (F_pad, T), power=2.0
        # mel projection: plain (n_mels, F_pad) @ (F_pad, T) -- T stays the lane axis
        mel = jnp.dot(mel_t, power.astype(mel_t.dtype),
                      preferred_element_type=jnp.float32)              # (n_mels, T)
        logmel = jnp.log(mel + 1e-6)
        # subtract per-(batch, mel) mean over time (torch: out - out.mean(axis=2))
        mean = jnp.sum(logmel, axis=1, keepdims=True) * inv_t
        out_ref[bi] = logmel - mean
        return carry

    lax.fori_loop(0, frames_ref.shape[0], per_batch, 0)


def logfbank_cal(x, *, sample_rate, n_fft, win_length, hop_length, n_mels):
    """x: (B, num_samples) float32 waveform -> (B, n_mels, T) float32."""
    assert win_length == n_fft, "this kernel assumes win_length == n_fft"
    B, _ = x.shape
    n_freqs = n_fft // 2 + 1
    f_pad = ((n_freqs + 127) // 128) * 128            # lane-dense padded freq width

    # --- glue: center (reflect) padding + framing into (B, n_fft, T), bf16 ---
    frames, T = _frame_signal_t(x, n_fft, hop_length)

    # --- precomputed bf16 transform matrices (window folded into the DFT matrix) ---
    dft_t = jnp.asarray(dft_matrix_t_combined(n_fft, win_length, f_pad),
                        dtype=jnp.bfloat16)                              # (2*F_pad, n_fft)
    mel_fb_t = jnp.asarray(
        melscale_fbanks_t_padded(n_freqs, f_pad, 0.0, sample_rate / 2.0,
                                 n_mels, sample_rate), dtype=jnp.bfloat16)  # (n_mels, F_pad)

    vmem_cap = _tpu_vmem_capacity_bytes()
    vmem_limit = min(vmem_cap * 3 // 4, 96 * 1024 * 1024)
    num_cores = _num_tensorcores_per_device()
    bb = _pick_batch_block(B, T, n_fft, f_pad, n_mels, num_cores, vmem_limit)
    grid = (B // bb,)

    out = pl.pallas_call(
        logfbank_kernel,
        out_shape=jax.ShapeDtypeStruct((B, n_mels, T), jnp.float32),
        grid_spec=pltpu.PrefetchScalarGridSpec(
            num_scalar_prefetch=0,
            grid=grid,
            in_specs=[
                pl.BlockSpec((bb, n_fft, T), lambda g: (g, 0, 0)),
                pl.BlockSpec((2 * f_pad, n_fft), lambda g: (0, 0)),   # constant block
                pl.BlockSpec((n_mels, f_pad), lambda g: (0, 0)),      # constant block
            ],
            out_specs=pl.BlockSpec((bb, n_mels, T), lambda g: (g, 0, 0)),
        ),
        compiler_params=pltpu.CompilerParams(
            dimension_semantics=("parallel",),
            vmem_limit_bytes=int(vmem_limit),
        ),
    )(frames, dft_t, mel_fb_t)

    # already in PyTorch MelSpectrogram layout: (B, n_mels, T)
    return out


# ----------------------------------- main -----------------------------------

if __name__ == "__main__":
    # small shapes consistent with the module's forward (waveform batch)
    sample_rate = 8000
    n_fft = 128
    win_length = 128
    hop_length = 64
    n_mels = 32
    batch = 2
    num_samples = 1024

    key = jax.random.PRNGKey(0)
    x = jax.random.normal(key, (batch, num_samples), dtype=jnp.float32)

    out = logfbank_cal(
        x,
        sample_rate=sample_rate,
        n_fft=n_fft,
        win_length=win_length,
        hop_length=hop_length,
        n_mels=n_mels,
    )
    out = jax.block_until_ready(out)

    assert out.shape == (batch, n_mels, 1 + num_samples // hop_length), out.shape
    assert jnp.all(jnp.isfinite(out))
    # per-(batch, mel) time mean should be ~0 after subtraction (done in f32 in-kernel)
    assert float(jnp.max(jnp.abs(jnp.mean(out, axis=2)))) < 1e-3
    print("KERNEL_OK")
</pallas_src>

<mosaic_0001>
module attributes {stable_mosaic.version = 11 : i64} {
  func.func @logfbank_kernel(%arg0: i32, %arg1: memref<2x128x17xbf16, #tpu.memory_space<vmem>>, %arg2: memref<256x128xbf16, #tpu.memory_space<vmem>>, %arg3: memref<32x128xbf16, #tpu.memory_space<vmem>>, %arg4: memref<2x32x17xf32, #tpu.memory_space<vmem>>) attributes {dimension_semantics = [#tpu.dimension_semantics<parallel>], iteration_bounds = array<i64: 1>, scalar_prefetch = 0 : i64, scratch_operands = 0 : i64, tpu.core_type = #tpu.core_type<tc>, window_params = [{transform_indices = @transform_0, window_bounds = array<i64: 2, 128, 17>}, {pipeline_mode = #tpu.pipeline_mode<synchronous>, transform_indices = @transform_1, window_bounds = array<i64: 256, 128>}, {pipeline_mode = #tpu.pipeline_mode<synchronous>, transform_indices = @transform_2, window_bounds = array<i64: 32, 128>}, {transform_indices = @transform_3, window_bounds = array<i64: 2, 32, 17>}]} {
    %c0 = arith.constant 0 : index
    %c0_0 = arith.constant 0 : index
    %0 = vector.load %arg2[%c0, %c0_0] : memref<256x128xbf16, #tpu.memory_space<vmem>>, vector<256x128xbf16>
    %c0_1 = arith.constant 0 : index
    %c0_2 = arith.constant 0 : index
    %1 = vector.load %arg3[%c0_1, %c0_2] : memref<32x128xbf16, #tpu.memory_space<vmem>>, vector<32x128xbf16>
    %cst = arith.constant 0.0588235296 : f32
    %c0_i32 = arith.constant 0 : i32
    %c2_i32 = arith.constant 2 : i32
    %2 = arith.addi %c0_i32, %c2_i32 : i32
    %c1_i32 = arith.constant 1 : i32
    scf.for %arg5 = %c0_i32 to %2 step %c1_i32  : i32 {
      %3 = arith.index_cast %arg5 : i32 to index
      %c0_4 = arith.constant 0 : index
      %c0_5 = arith.constant 0 : index
      %4 = vector.load %arg1[%3, %c0_4, %c0_5] : memref<2x128x17xbf16, #tpu.memory_space<vmem>>, vector<1x128x17xbf16>
      %5 = vector.shape_cast %4 : vector<1x128x17xbf16> to vector<128x17xbf16>
      %cst_6 = arith.constant dense<0.000000e+00> : vector<256x17xf32>
      %6 = tpu.matmul %0, %5, %cst_6 {dimension_numbers = #tpu.dot_dimension_numbers<[1], [0], [0], [1], [0, 0, 1, 1], [], []>} : vector<256x128xbf16>, vector<128x17xbf16>, vector<256x17xf32> -> vector<256x17xf32>
      %7 = vector.extract_strided_slice %6 {offsets = [0, 0], sizes = [128, 17], strides = [1, 1]} : vector<256x17xf32> to vector<128x17xf32>
      %8 = vector.extract_strided_slice %6 {offsets = [128, 0], sizes = [128, 17], strides = [1, 1]} : vector<256x17xf32> to vector<128x17xf32>
      %9 = arith.mulf %7, %7 : vector<128x17xf32>
      %10 = arith.mulf %8, %8 : vector<128x17xf32>
      %11 = arith.addf %9, %10 : vector<128x17xf32>
      %12 = arith.truncf %11 : vector<128x17xf32> to vector<128x17xbf16>
      %cst_7 = arith.constant dense<0.000000e+00> : vector<32x17xf32>
      %13 = tpu.matmul %1, %12, %cst_7 {dimension_numbers = #tpu.dot_dimension_numbers<[1], [0], [0], [1], [0, 0, 1, 1], [], []>} : vector<32x128xbf16>, vector<128x17xbf16>, vector<32x17xf32> -> vector<32x17xf32>
      %cst_8 = arith.constant 9.99999997E-7 : f32
      %14 = vector.broadcast %cst_8 : f32 to vector<32x17xf32>
      %15 = arith.addf %13, %14 : vector<32x17xf32>
      %16 = math.log %15 : vector<32x17xf32>
      %cst_9 = arith.constant dense<0.000000e+00> : vector<32xf32>
      %17 = vector.multi_reduction <add>, %16, %cst_9 [1] : vector<32x17xf32> to vector<32xf32>
      %18 = vector.shape_cast %17 : vector<32xf32> to vector<32x1xf32>
      %19 = vector.broadcast %cst : f32 to vector<32x1xf32>
      %20 = arith.mulf %18, %19 : vector<32x1xf32>
      %21 = vector.broadcast %20 : vector<32x1xf32> to vector<32x17xf32>
      %22 = arith.subf %16, %21 : vector<32x17xf32>
      %23 = arith.index_cast %arg5 : i32 to index
      %c0_10 = arith.constant 0 : index
      %c0_11 = arith.constant 0 : index
      %24 = vector.load %arg4[%23, %c0_10, %c0_11] : memref<2x32x17xf32, #tpu.memory_space<vmem>>, vector<1x32x17xf32>
      %25 = vector.shape_cast %24 : vector<1x32x17xf32> to vector<32x17xf32>
      %26 = vector.shape_cast %22 : vector<32x17xf32> to vector<1x32x17xf32>
      tpu.vector_store %arg4[%23, %c0_10, %c0_11], %26 {strides = array<i32>} : memref<2x32x17xf32, #tpu.memory_space<vmem>>, vector<1x32x17xf32>,
    }
    %c2_i32_3 = arith.constant 2 : i32
    return
  }
  func.func @transform_0(%arg0: i32) -> (i32, i32, i32) {
    %c0_i32 = arith.constant 0 : i32
    %c0_i32_0 = arith.constant 0 : i32
    %c0_i32_1 = arith.constant 0 : i32
    return %arg0, %c0_i32, %c0_i32_0 : i32, i32, i32
  }
  func.func @transform_1(%arg0: i32) -> (i32, i32) {
    %c0_i32 = arith.constant 0 : i32
    %c0_i32_0 = arith.constant 0 : i32
    %c0_i32_1 = arith.constant 0 : i32
    return %c0_i32, %c0_i32_0 : i32, i32
  }
  func.func @transform_2(%arg0: i32) -> (i32, i32) {
    %c0_i32 = arith.constant 0 : i32
    %c0_i32_0 = arith.constant 0 : i32
    %c0_i32_1 = arith.constant 0 : i32
    return %c0_i32, %c0_i32_0 : i32, i32
  }
  func.func @transform_3(%arg0: i32) -> (i32, i32, i32) {
    %c0_i32 = arith.constant 0 : i32
    %c0_i32_0 = arith.constant 0 : i32
    %c0_i32_1 = arith.constant 0 : i32
    return %arg0, %c0_i32, %c0_i32_0 : i32, i32, i32
  }
}

</mosaic_0001>

<bundles_post_ra>
// kernel: tpu_custom_call.1
= control target key start
LH: loop header
LB: loop body
LE: loop exit
PB: predicated region body
PF: predicated region fallthrough
CT: control target
= control target key end

     0   :  { %s986_s0 = inlined_call_operand.vmem [shape: bf16[2,128,17], index: 0, kind: input, shape index: {}]   ;;  %s987_s1 = inlined_call_operand.vmem [shape: bf16[256,128], index: 1, kind: input, shape index: {}]   ;;  %s988_s3 = inlined_call_operand.vmem [shape: f32[2,32,17], index: 3, kind: output, shape index: {}]   ;;  %s989_s2 = inlined_call_operand.vmem [shape: bf16[32,128], index: 2, kind: input, shape index: {}]  }
   0x1   :  { %v733_v0 = vld [vmem:[%s987_s1] sm:$0xf]  ;;  %v738_v1 = vld [vmem:[%s987_s1 + $0x4] sm:$0xf]  ;;  %v743_v2 = vld [vmem:[%s987_s1 + $0x8] sm:$0xf] }
   0x2   :  { %990 = vst [vmem:[#allocation2_spill] sm:$0xff] %v733_v0  ;;  %991 = vst [vmem:[#allocation3_spill] sm:$0xff] %v738_v1  ;;  %v748_v3 = vld [vmem:[%s987_s1 + $0xc] sm:$0xf]  ;;  %v753_v4 = vld [vmem:[%s987_s1 + $0x10] sm:$0xf] }
   0x3   :  { %992 = vst [vmem:[#allocation4_spill] sm:$0xff] %v743_v2  ;;  %993 = vst [vmem:[#allocation5_spill] sm:$0xff] %v748_v3  ;;  %v758_v5 = vld [vmem:[%s987_s1 + $0x14] sm:$0xf]  ;;  %v763_v6 = vld [vmem:[%s987_s1 + $0x18] sm:$0xf] }
   0x4   :  { %994 = vst [vmem:[#allocation6_spill] sm:$0xff] %v753_v4  ;;  %995 = vst [vmem:[#allocation7_spill] sm:$0xff] %v758_v5  ;;  %v768_v7 = vld [vmem:[%s987_s1 + $0x1c] sm:$0xf]  ;;  %v773_v8 = vld [vmem:[%s987_s1 + $0x20] sm:$0xf] }
   0x5   :  { %996 = vst [vmem:[#allocation8_spill] sm:$0xff] %v763_v6  ;;  %997 = vst [vmem:[#allocation9_spill] sm:$0xff] %v768_v7  ;;  %v778_v9 = vld [vmem:[%s987_s1 + $0x24] sm:$0xf]  ;;  %v783_v10 = vld [vmem:[%s987_s1 + $0x28] sm:$0xf] }
   0x6   :  { %998 = vst [vmem:[#allocation10_spill] sm:$0xff] %v773_v8  ;;  %999 = vst [vmem:[#allocation11_spill] sm:$0xff] %v778_v9  ;;  %v788_v11 = vld [vmem:[%s987_s1 + $0x2c] sm:$0xf]  ;;  %v793_v12 = vld [vmem:[%s987_s1 + $0x30] sm:$0xf] }
   0x7   :  { %v798_v13 = vld [vmem:[%s987_s1 + $0x34] sm:$0xf]  ;;  %v803_v14 = vld [vmem:[%s987_s1 + $0x38] sm:$0xf]  ;;  %v808_v15 = vld [vmem:[%s987_s1 + $0x3c] sm:$0xf] }
   0x8   :  { %v813_v16 = vld [vmem:[%s987_s1 + $0x40] sm:$0xf]  ;;  %v818_v17 = vld [vmem:[%s987_s1 + $0x44] sm:$0xf]  ;;  %v823_v18 = vld [vmem:[%s987_s1 + $0x48] sm:$0xf] }
   0x9   :  { %v828_v19 = vld [vmem:[%s987_s1 + $0x4c] sm:$0xf]  ;;  %v833_v20 = vld [vmem:[%s987_s1 + $0x50] sm:$0xf]  ;;  %v838_v21 = vld [vmem:[%s987_s1 + $0x54] sm:$0xf] }
   0xa   :  { %v843_v22 = vld [vmem:[%s987_s1 + $0x58] sm:$0xf]  ;;  %v848_v23 = vld [vmem:[%s987_s1 + $0x5c] sm:$0xf]  ;;  %v853_v24 = vld [vmem:[%s987_s1 + $0x60] sm:$0xf] }
   0xb   :  { %v858_v25 = vld [vmem:[%s987_s1 + $0x64] sm:$0xf]  ;;  %v863_v26 = vld [vmem:[%s987_s1 + $0x68] sm:$0xf]  ;;  %v868_v27 = vld [vmem:[%s987_s1 + $0x6c] sm:$0xf] }
   0xc   :  { %v873_v28 = vld [vmem:[%s987_s1 + $0x70] sm:$0xf]  ;;  %v878_v29 = vld [vmem:[%s987_s1 + $0x74] sm:$0xf]  ;;  %v883_v30 = vld [vmem:[%s987_s1 + $0x78] sm:$0xf] }
   0xd   :  { %v888_v31 = vld [vmem:[%s987_s1 + $0x7c] sm:$0xf]  ;;  %v893_v32 = vld [vmem:[%s989_s2] sm:$0xf]  ;;  %v898_v33 = vld [vmem:[%s989_s2 + $0x4] sm:$0xf] }
   0xe   :  { %v903_v34 = vld [vmem:[%s989_s2 + $0x8] sm:$0xf]  ;;  %v908_v35 = vld [vmem:[%s989_s2 + $0xc] sm:$0xf]  ;;  %s910_s1 = smov 0  }
   0xf LB: > { %v1000_v1 = vld [vmem:[#allocation3_spill] sm:$0xff]  ;;  %v1001_v0 = vld [vmem:[#allocation2_spill] sm:$0xff]  ;;  %s575_s30 = sshll.u32 %s708_s1, 6  ;;  %v1002_v3 = vld [vmem:[#allocation5_spill] sm:$0xff]  ;;  %v553_v49 = vcombine.low %v783_v10, %v788_v11  ;;  %v554_v50 = vcombine.low %v793_v12, %v798_v13  ;;  %v555_v51 = vcombine.low %v803_v14, %v808_v15  ;;  %v556_v52 = vcombine.low %v813_v16, %v818_v17  ;;  %s574_s2 = sshll.u32 %s708_s1, 5  ;;  %s708_s1 = sphi %s910_s1, %s56_s1  }
  0x10   : > { %v548_v36 = vcombine.low %v1001_v0, %v1000_v1  ;;  %s59_s6 = scalar_lea.vmem %s986_s0, %s575_s30  ;;  %v1003_v2 = vld [vmem:[#allocation4_spill] sm:$0xff]  ;;  %v1004_v5 = vld [vmem:[#allocation7_spill] sm:$0xff]  ;;  %v1005_v4 = vld [vmem:[#allocation6_spill] sm:$0xff]  ;;  %v557_v53 = vcombine.low %v823_v18, %v828_v19  ;;  %v558_v54 = vcombine.low %v833_v20, %v838_v21  ;;  %v559_v55 = vcombine.low %v843_v22, %v848_v23  ;;  %s528_s9 = scalar_lea.vmem %s988_s3, %s574_s2 }
  0x11   : > { %v686_v37 = vld [vmem:[%s59_s6] sm:$0xff]   ;;  %v687_v38 = vld [vmem:[%s59_s6 + $0x8] sm:$0xff]   ;;  %v688_v39 = vld [vmem:[%s59_s6 + $0x10] sm:$0xff]   ;;  %v549_v45 = vcombine.low %v1003_v2, %v1002_v3  ;;  %v550_v46 = vcombine.low %v1005_v4, %v1004_v5  ;;  %v560_v56 = vcombine.low %v853_v24, %v858_v25  ;;  %v561_v57 = vcombine.low %v863_v26, %v868_v27  ;;  %s56_s1 = sadd.s32 1, %s708_s1  }
  0x12   : > { %626 = vmatprep.mubr.bf16.mxu0 %v548_v36  ;;  %610 = vmatprep.subr.bf16.mxu0 %v686_v37  ;;  %v689_v40 = vld [vmem:[%s59_s6 + $0x18] sm:$0xff]   ;;  %v690_v41 = vld [vmem:[%s59_s6 + $0x20] sm:$0xff]   ;;  %v691_v42 = vld [vmem:[%s59_s6 + $0x28] sm:$0xff]   ;;  %v562_v58 = vcombine.low %v873_v28, %v878_v29  ;;  %v563_v59 = vcombine.low %v883_v30, %v888_v31  ;;  %v572_v60 = vcombine.low %v893_v32, %v898_v33  ;;  %vm506_vm0 = vcmask 138240   ;;  %p53_p0 = scmp.ge.s32.totalorder %s56_s1, 2  }
  0x13   : > { %611 = vmatpush3.bf16.msra.mxu0 %v686_v37  ;;  %v692_v43 = vld [vmem:[%s59_s6 + $0x30] sm:$0xff]   ;;  %v693_v44 = vld [vmem:[%s59_s6 + $0x38] sm:$0xff]   ;;  %v1008_v9 = vld [vmem:[#allocation11_spill] sm:$0xff] }
  0x14   : > { %612 = vmatprep.subr.bf16.mxu0 %v687_v38  ;;  %v1006_v7 = vld [vmem:[#allocation9_spill] sm:$0xff]  ;;  %v1007_v6 = vld [vmem:[#allocation8_spill] sm:$0xff]  ;;  %v1009_v8 = vld [vmem:[#allocation10_spill] sm:$0xff]  ;;  %674 = vmatprep.mubr.bf16.mxu1 %v572_v60 }
  0x15   : > { %v551_v47 = vcombine.low %v1007_v6, %v1006_v7  ;;  %v552_v48 = vcombine.low %v1009_v8, %v1008_v9 }
  0x17   : > { %613 = vmatpush3.bf16.msra.mxu0 %v687_v38 }
  0x18   : > { %614 = vmatprep.subr.bf16.mxu0 %v688_v39 }
  0x1b   : > { %615 = vmatpush3.bf16.msra.mxu0 %v688_v39 }
  0x1c   : > { %616 = vmatprep.subr.bf16.mxu0 %v689_v40 }
  0x1f   : > { %617 = vmatpush3.bf16.msra.mxu0 %v689_v40 }
  0x20   : > { %618 = vmatprep.subr.bf16.mxu0 %v690_v41 }
  0x23   : > { %619 = vmatpush3.bf16.msra.mxu0 %v690_v41 }
  0x24   : > { %620 = vmatprep.subr.bf16.mxu0 %v691_v42 }
  0x27   : > { %621 = vmatpush3.bf16.msra.mxu0 %v691_v42 }
  0x28   : > { %622 = vmatprep.subr.bf16.mxu0 %v692_v43 }
  0x2b   : > { %623 = vmatpush3.bf16.msra.mxu0 %v692_v43 }
  0x2c   : > { %624 = vmatprep.subr.bf16.mxu0 %v693_v44 }
  0x2f   : > { %625 = vmatpush3.bf16.msra.mxu0 %v693_v44 }
  0x32   : > { %627 = vmatmul.mubr.bf16.vlgmr.msra.gmra.mrb[0].mxu0 %v549_v45 }
  0x33   : > { %630 = vmatprep.mubr.bf16.mxu0 %v550_v46 }
  0x3a   : > { %631 = vmatmul.mubr.bf16.gmra.mrb[4].mxu0 %v551_v47 }
  0x3b   : > { %634 = vmatprep.mubr.bf16.mxu0 %v552_v48 }
  0x42   : > { %635 = vmatmul.mubr.bf16.gmra.mrb[8].mxu0 %v553_v49 }
  0x43   : > { %638 = vmatprep.mubr.bf16.mxu0 %v554_v50 }
  0x4a   : > { %639 = vmatmul.mubr.bf16.gmra.mrb[12].mxu0 %v555_v51 }
  0x4b   : > { %642 = vmatprep.mubr.bf16.mxu0 %v556_v52 }
  0x52   : > { %643 = vmatmul.mubr.bf16.gmra.mrb[16].mxu0 %v557_v53 }
  0x53   : > { %646 = vmatprep.mubr.bf16.mxu0 %v558_v54 }
  0x5a   : > { %647 = vmatmul.mubr.bf16.gmra.mrb[20].mxu0 %v559_v55 }
  0x5b   : > { %650 = vmatprep.mubr.bf16.mxu0 %v560_v56 }
  0x62   : > { %651 = vmatmul.mubr.bf16.gmra.mrb[24].mxu0 %v561_v57 }
  0x63   : > { %654 = vmatprep.mubr.bf16.mxu0 %v562_v58 }
  0x6a   : > { %655 = vmatmul.mubr.bf16.gmra.mrb[28].mxu0 %v563_v59 }
 0x105   : > { %v628_v61 = vpop.f32.mrb[0].mxu0 }
 0x106   : > { %v254_v62 = vpop.f32.mrb[1].mxu0  ;;  %v383_v50 = vmul.f32 %v628_v61, %v628_v61 }
 0x107   : > { %v629_v63 = vpop.f32.mrb[2].mxu0  ;;  %v381_v53 = vmul.f32 %v254_v62, %v254_v62 }
 0x108   : > { %v257_v36 = vpop.f32.mrb[3].mxu0  ;;  %v384_v56 = vmul.f32 %v629_v63, %v629_v63 }
 0x109   : > { %v382_v60 = vmul.f32 %v257_v36, %v257_v36 }
 0x10d   : > { %v632_v37 = vpop.f32.mrb[4].mxu0 }
 0x10e   : > { %v270_v38 = vpop.f32.mrb[5].mxu0  ;;  %v387_v7 = vmul.f32 %v632_v37, %v632_v37 }
 0x10f   : > { %v633_v39 = vpop.f32.mrb[6].mxu0 }
 0x110   : > { %v273_v40 = vpop.f32.mrb[7].mxu0 }
 0x111   : > { %v386_v36 = vmul.f32 %v273_v40, %v273_v40 }
 0x115   : > { %v636_v41 = vpop.f32.mrb[8].mxu0 }
 0x116   : > { %v286_v42 = vpop.f32.mrb[9].mxu0  ;;  %v391_v37 = vmul.f32 %v636_v41, %v636_v41 }
 0x117   : > { %v637_v43 = vpop.f32.mrb[10].mxu0 }
 0x118   : > { %v289_v44 = vpop.f32.mrb[11].mxu0 }
 0x11d   : > { %v953_v45 = vpop.f32.mrb[12].mxu0 }
 0x11e   : > { %v955_v46 = vpop.f32.mrb[13].mxu0 }
 0x11f   : > { %v957_v47 = vpop.f32.mrb[14].mxu0 }
 0x120   : > { %v959_v48 = vpop.f32.mrb[15].mxu0 }
 0x125   : > { %v644_v49 = vpop.f32.mrb[16].mxu0 }
 0x126   : > { %v399_v51 = vmul.f32 %v644_v49, %v644_v49  ;;  %v318_v52 = vpop.f32.mrb[17].mxu0  ;;  %v385_v49 = vmul.f32 %v270_v38, %v270_v38 }
 0x127   : > { %v397_v54 = vmul.f32 %v318_v52, %v318_v52  ;;  %v645_v55 = vpop.f32.mrb[18].mxu0  ;;  %v388_v52 = vmul.f32 %v633_v39, %v633_v39 }
 0x128   : > { %v415_v57 = vadd.f32 %v399_v51, %v383_v50  ;;  %v400_v58 = vmul.f32 %v645_v55, %v645_v55  ;;  %v321_v59 = vpop.f32.mrb[19].mxu0 }
 0x129   : > { %v413_v0 = vadd.f32 %v397_v54, %v381_v53  ;;  %v398_v1 = vmul.f32 %v321_v59, %v321_v59 }
 0x12a   : > { %v416_v2 = vadd.f32 %v400_v58, %v384_v56  ;;  %v389_v56 = vmul.f32 %v286_v42, %v286_v42  ;;  %v395_v42 = vmul.f32 %v953_v45, %v953_v45 }
 0x12b   : > { %v414_v3 = vadd.f32 %v398_v1, %v382_v60 }
 0x12c   : > { %v430_v4 = vpack.c.bf16 %v416_v2, %v415_v57 }
 0x12d   : > { %v648_v5 = vpop.f32.mrb[20].mxu0  ;;  %v429_v6 = vpack.c.bf16 %v414_v3, %v413_v0 }
 0x12e   : > { %v403_v8 = vmul.f32 %v648_v5, %v648_v5  ;;  %v334_v61 = vpop.f32.mrb[21].mxu0 }
 0x12f   : > { %v401_v9 = vmul.f32 %v334_v61, %v334_v61  ;;  %v649_v62 = vpop.f32.mrb[22].mxu0  ;;  %658 = vmatprep.subr.bf16.mxu1 %v429_v6 }
 0x130   : > { %v419_v63 = vadd.f32 %v403_v8, %v387_v7  ;;  %v404_v50 = vmul.f32 %v649_v62, %v649_v62  ;;  %v337_v51 = vpop.f32.mrb[23].mxu0  ;;  %659 = vmatpush3.bf16.msra.mxu1 %v429_v6  ;;  %v392_v7 = vmul.f32 %v637_v43, %v637_v43  ;;  %v393_v43 = vmul.f32 %v955_v46, %v955_v46 }
 0x131   : > { %v417_v53 = vadd.f32 %v401_v9, %v385_v49  ;;  %v402_v54 = vmul.f32 %v337_v51, %v337_v51  ;;  %660 = vmatprep.subr.bf16.mxu1 %v430_v4  ;;  %v390_v9 = vmul.f32 %v289_v44, %v289_v44  ;;  %v396_v44 = vmul.f32 %v957_v47, %v957_v47 }
 0x132   : > { %v420_v1 = vadd.f32 %v404_v50, %v388_v52  ;;  %v573_v47 = vcombine.low %v903_v34, %v908_v35 }
 0x133   : > { %v418_v2 = vadd.f32 %v402_v54, %v386_v36  ;;  %v394_v54 = vmul.f32 %v959_v48, %v959_v48 }
 0x134   : > { %661 = vmatpush3.bf16.msra.mxu1 %v430_v4  ;;  %v432_v0 = vpack.c.bf16 %v420_v1, %v419_v63 }
 0x135   : > { %v652_v3 = vpop.f32.mrb[24].mxu0  ;;  %v431_v5 = vpack.c.bf16 %v418_v2, %v417_v53 }
 0x136   : > { %v407_v38 = vmul.f32 %v652_v3, %v652_v3  ;;  %v350_v55 = vpop.f32.mrb[25].mxu0 }
 0x137   : > { %v405_v57 = vmul.f32 %v350_v55, %v350_v55  ;;  %v653_v39 = vpop.f32.mrb[26].mxu0  ;;  %662 = vmatprep.subr.bf16.mxu1 %v431_v5 }
 0x138   : > { %v423_v8 = vadd.f32 %v407_v38, %v391_v37  ;;  %v408_v6 = vmul.f32 %v653_v39, %v653_v39  ;;  %v353_v40 = vpop.f32.mrb[27].mxu0  ;;  %663 = vmatpush3.bf16.msra.mxu1 %v431_v5 }
 0x139   : > { %v421_v58 = vadd.f32 %v405_v57, %v389_v56  ;;  %v406_v59 = vmul.f32 %v353_v40, %v353_v40  ;;  %664 = vmatprep.subr.bf16.mxu1 %v432_v0 }
 0x13a   : > { %v424_v4 = vadd.f32 %v408_v6, %v392_v7 }
 0x13b   : > { %v422_v60 = vadd.f32 %v406_v59, %v390_v9 }
 0x13c   : > { %665 = vmatpush3.bf16.msra.mxu1 %v432_v0  ;;  %v434_v61 = vpack.c.bf16 %v424_v4, %v423_v8 }
 0x13d   : > { %v656_v41 = vpop.f32.mrb[28].mxu0  ;;  %v433_v49 = vpack.c.bf16 %v422_v60, %v421_v58 }
 0x13e   : > { %v411_v62 = vmul.f32 %v656_v41, %v656_v41  ;;  %v366_v52 = vpop.f32.mrb[29].mxu0 }
 0x13f   : > { %v409_v63 = vmul.f32 %v366_v52, %v366_v52  ;;  %v657_v50 = vpop.f32.mrb[30].mxu0  ;;  %666 = vmatprep.subr.bf16.mxu1 %v433_v49 }
 0x140   : > { %v427_v51 = vadd.f32 %v411_v62, %v395_v42  ;;  %v412_v36 = vmul.f32 %v657_v50, %v657_v50  ;;  %v369_v53 = vpop.f32.mrb[31].mxu0  ;;  %667 = vmatpush3.bf16.msra.mxu1 %v433_v49 }
 0x141   : > { %v425_v1 = vadd.f32 %v409_v63, %v393_v43  ;;  %v410_v45 = vmul.f32 %v369_v53, %v369_v53  ;;  %668 = vmatprep.subr.bf16.mxu1 %v434_v61 }
 0x142   : > { %v428_v2 = vadd.f32 %v412_v36, %v396_v44 }
 0x143   : > { %v426_v0 = vadd.f32 %v410_v45, %v394_v54 }
 0x144   : > { %669 = vmatpush3.bf16.msra.mxu1 %v434_v61  ;;  %v436_v46 = vpack.c.bf16 %v428_v2, %v427_v51 }
 0x145   : > { %v435_v3 = vpack.c.bf16 %v426_v0, %v425_v1 }
 0x147   : > { %670 = vmatprep.subr.bf16.mxu1 %v435_v3 }
 0x148   : > { %671 = vmatpush3.bf16.msra.mxu1 %v435_v3 }
 0x149   : > { %672 = vmatprep.subr.bf16.mxu1 %v436_v46 }
 0x14c   : > { %673 = vmatpush3.bf16.msra.mxu1 %v436_v46 }
 0x14f   : > { %675 = vmatmul.mubr.bf16.vlgmr.msra.gmra.mrb[0].mxu1 %v573_v47 }
 0x222   : > { %v676_v5 = vpop.f32.mrb[0].mxu1 }
 0x223   : > { %v492_v37 = vadd.f32 1e-06, %v676_v5  ;;  %v483_v38 = vpop.f32.mrb[1].mxu1 }
 0x224   : > { %v484_v48 = vadd.f32 1e-06, %v483_v38  ;;  %v677_v55 = vpop.f32.mrb[2].mxu1 }
 0x225   : > { %694 = vlog2.f32 %v492_v37  ;;  %v495_v56 = vadd.f32 1e-06, %v677_v55  ;;  %v486_v57 = vpop.f32.mrb[3].mxu1 }
 0x226   : > { %696 = vlog2.f32 %v484_v48  ;;  %v487_v39 = vadd.f32 1e-06, %v486_v57 }
 0x227   : > { %698 = vlog2.f32 %v495_v56 }
 0x228   : > { %700 = vlog2.f32 %v487_v39 }
 0x22f   : > { %v695_v7 = vpop.eup %694 }
 0x230   : > { %v697_v8 = vpop.eup %696  ;;  %v503_v6 = vmul.f32 0.6931472, %v695_v7 }
 0x231   : > { %v699_v40 = vpop.eup %698  ;;  %v499_v9 = vmul.f32 0.6931472, %v697_v8 }
 0x232   : > { %v701_v58 = vpop.eup %700  ;;  %v513_v59 = vsel %vm506_vm0, %v503_v6, 0.0  ;;  %v505_v4 = vmul.f32 0.6931472, %v699_v40 }
 0x233   : > { %514 = vadd.xlane.f32.xlu1 %v513_v59  ;;  %v507_v60 = vsel %vm506_vm0, %v499_v9, 0.0  ;;  %v501_v61 = vmul.f32 0.6931472, %v701_v58 }
 0x234   : > { %508 = vadd.xlane.f32.xlu0 %v507_v60  ;;  %v516_v41 = vsel %vm506_vm0, %v505_v4, 0.0 }
 0x235   : > { %v510_v49 = vsel %vm506_vm0, %v501_v61, 0.0 }
 0x237   : > { %517 = vadd.xlane.f32.xlu1 %v516_v41 }
 0x238   : > { %511 = vadd.xlane.f32.xlu0 %v510_v49 }
 0x2c0   : > { %v515_v42 = vpop.xlane.xlu1 %514 }
 0x2c1   : > { %v521_v62 = vmul.f32 0.05882353, %v515_v42  ;;  %v509_v52 = vpop.xlane.xlu0 %508 }
 0x2c2   : > { %v519_v43 = vmul.f32 0.05882353, %v509_v52 }
 0x2c3   : > { %v525_v63 = vsub.f32 %v503_v6, %v521_v62 }
 0x2c4   : > { %v523_v50 = vsub.f32 %v499_v9, %v519_v43  ;;  %v518_v44 = vpop.xlane.xlu1 %517  ;;  %55 = sbr.rel (!%p53_p0) target bundleno = 15 (0xf), region = 41 }
 0x2c5   : > { %531 = vst.msk [vmem:[%s528_s9 + $0x10] sm:$0xff] %vm506_vm0, %v525_v63  ;;  %v522_v51 = vmul.f32 0.05882353, %v518_v44  ;;  %v512_v36 = vpop.xlane.xlu0 %511 }
 0x2c6   : > { %529 = vst.msk [vmem:[%s528_s9] sm:$0xff] %vm506_vm0, %v523_v50  ;;  %v520_v53 = vmul.f32 0.05882353, %v512_v36 }
 0x2c7   : > { %v526_v54 = vsub.f32 %v505_v4, %v522_v51 }
 0x2c8   : > { %v524_v1 = vsub.f32 %v501_v61, %v520_v53 }
 0x2c9   : > { %532 = vst.msk [vmem:[%s528_s9 + $0x18] sm:$0xff] %vm506_vm0, %v526_v54 }
 0x2ca   : > { %530 = vst.msk [vmem:[%s528_s9 + $0x8] sm:$0xff] %vm506_vm0, %v524_v1 }

</bundles_post_ra>
